<compile_context>
chip_gen: v7x
topology: tpu7x:2x2x1
jax: 0.10.0
libtpu: 0.0.40
codegen_flags: <defaults>
</compile_context>

<pallas_src>
import jax
import jax.numpy as jnp
from jax.experimental import pallas as pl
from jax.experimental.pallas import tpu as pltpu

FEATURE_COUNT = 2048   # self.feature_count
THETA_COUNT = 85       # self.total_theta_count
THETA_PAD = 128        # theta padded to a full lane width
HIDDEN = 1024          # fc_layers hidden width
ITERATIONS = 3         # regressor iterations

TILE_F = 256           # encoder output-feature tile (multiple of 128)
TILE_K = 256           # encoder reduction (d_in) tile
BATCH_TILE = 8         # batch rows padded to a sublane multiple


def _compute_vmem_limit_bytes():
    # v7x has only 64 MiB of VMEM per TensorCore; request <= ~80% of whatever
    # the running chip reports, falling back to the smallest known capacity.
    cap = 64 * 1024 * 1024
    try:
        info = pltpu.get_tpu_info()
        cap = int(getattr(info, "vmem_capacity_bytes", cap)) or cap
    except Exception:
        pass
    return max(int(cap * 4 // 5), 32 * 1024 * 1024)


_VMEM_LIMIT_BYTES = _compute_vmem_limit_bytes()


def _pad_axis(x, multiple, axis):
    size = x.shape[axis]
    target = ((size + multiple - 1) // multiple) * multiple
    if target == size:
        return x
    pad = [(0, 0)] * x.ndim
    pad[axis] = (0, target - size)
    return jnp.pad(x, pad)


# ----------------------------------------------------------------------------
# Encoder kernel (proxy for ResNet50), tiled matmul + bias + ReLU.
# ----------------------------------------------------------------------------
# TODO(synk): the real ResNet50 encoder is an external module not defined in
# the reference snippet; it is replaced here by a single linear + ReLU
# projection producing the 2048-d feature vector.
def _encoder_kernel(x_ref, w_ref, b_ref, o_ref, acc_ref):
    k = pl.program_id(1)

    @pl.when(k == 0)
    def _():
        acc_ref[...] = jnp.zeros_like(acc_ref)

    acc_ref[...] += jnp.dot(x_ref[...], w_ref[...],
                            preferred_element_type=jnp.float32)

    @pl.when(k == pl.num_programs(1) - 1)
    def _():
        o_ref[...] = jnp.maximum(acc_ref[...] + b_ref[...], 0.0).astype(o_ref.dtype)


def encoder_forward(x_bf16, w_enc_bf16, b_enc_f32):
    n_pad, d_pad = x_bf16.shape
    n_f = FEATURE_COUNT // TILE_F
    n_k = d_pad // TILE_K
    return pl.pallas_call(
        _encoder_kernel,
        out_shape=jax.ShapeDtypeStruct((n_pad, FEATURE_COUNT), jnp.bfloat16),
        grid_spec=pltpu.PrefetchScalarGridSpec(
            num_scalar_prefetch=0,
            grid=(n_f, n_k),
            in_specs=[
                pl.BlockSpec((n_pad, TILE_K), lambda f, k: (0, k)),
                pl.BlockSpec((TILE_K, TILE_F), lambda f, k: (k, f)),
                pl.BlockSpec((1, TILE_F), lambda f, k: (0, f)),
            ],
            out_specs=pl.BlockSpec((n_pad, TILE_F), lambda f, k: (0, f)),
            scratch_shapes=[pltpu.VMEM((n_pad, TILE_F), jnp.float32)],
        ),
        compiler_params=pltpu.CompilerParams(
            dimension_semantics=("parallel", "arbitrary"),
            vmem_limit_bytes=_VMEM_LIMIT_BYTES,
        ),
    )(x_bf16, w_enc_bf16, b_enc_f32)


# ----------------------------------------------------------------------------
# ThetaRegressor kernel: all 3 IEF iterations inside one kernel.
# The first FC layer acting on cat([feature, theta], 1) is split as
#   feature @ W1[:2048]  (loop invariant, computed once)  +  theta @ W1[2048:]
# which is mathematically identical to the concatenated matmul.
# Theta is padded 85 -> 128 (padded weight rows/cols are zero, so the padded
# lanes stay zero and do not affect the result).
# ----------------------------------------------------------------------------
def _regressor_kernel(feat_ref, mean_ref, w1f_ref, w1t_ref, b1_ref,
                      w2_ref, b2_ref, w3_ref, b3_ref, thetas_ref):
    # Loop-invariant feature contribution (bf16 x bf16 -> f32 on the MXU).
    h0 = jnp.dot(feat_ref[...], w1f_ref[...],
                 preferred_element_type=jnp.float32) + b1_ref[...]

    theta = mean_ref[...]                      # f32 accumulator, (N_pad, 128)
    thetas_sum = jnp.zeros_like(theta)

    # iterations = 3, statically unrolled.  Dropout layers are identity (eval).
    for _ in range(ITERATIONS):
        h1 = jnp.maximum(
            h0 + jnp.dot(theta.astype(jnp.bfloat16), w1t_ref[...],
                         preferred_element_type=jnp.float32),
            0.0,
        )
        h2 = jnp.maximum(
            jnp.dot(h1.astype(jnp.bfloat16), w2_ref[...],
                    preferred_element_type=jnp.float32) + b2_ref[...],
            0.0,
        )
        delta = jnp.dot(h2.astype(jnp.bfloat16), w3_ref[...],
                        preferred_element_type=jnp.float32) + b3_ref[...]
        theta = theta + delta
        thetas_sum = thetas_sum + theta        # matches `thetas += theta`

    thetas_ref[...] = thetas_sum


def regressor_forward(feature_bf16, mean_theta_p, reg_params):
    n_pad = feature_bf16.shape[0]
    w1f, w1t, b1, w2, b2, w3, b3 = reg_params
    return pl.pallas_call(
        _regressor_kernel,
        out_shape=jax.ShapeDtypeStruct((n_pad, THETA_PAD), jnp.float32),
        grid=(1,),
        in_specs=[
            pl.BlockSpec((n_pad, FEATURE_COUNT), lambda i: (0, 0)),
            pl.BlockSpec((n_pad, THETA_PAD), lambda i: (0, 0)),
            pl.BlockSpec((FEATURE_COUNT, HIDDEN), lambda i: (0, 0)),
            pl.BlockSpec((THETA_PAD, HIDDEN), lambda i: (0, 0)),
            pl.BlockSpec((1, HIDDEN), lambda i: (0, 0)),
            pl.BlockSpec((HIDDEN, HIDDEN), lambda i: (0, 0)),
            pl.BlockSpec((1, HIDDEN), lambda i: (0, 0)),
            pl.BlockSpec((HIDDEN, THETA_PAD), lambda i: (0, 0)),
            pl.BlockSpec((1, THETA_PAD), lambda i: (0, 0)),
        ],
        out_specs=pl.BlockSpec((n_pad, THETA_PAD), lambda i: (0, 0)),
        compiler_params=pltpu.CompilerParams(
            vmem_limit_bytes=_VMEM_LIMIT_BYTES,
        ),
    )(feature_bf16, mean_theta_p, w1f, w1t, b1, w2, b2, w3, b3)


# ----------------------------------------------------------------------------
# Parameter preparation: pad + cast raw f32 (PyTorch-layout) params once.
# ----------------------------------------------------------------------------
def prepare_params(w_enc, b_enc, w1, b1, w2, b2, w3, b3):
    # Encoder proxy weights: pad d_in to the K tile, cast to bf16.
    w_enc_p = _pad_axis(w_enc, TILE_K, 0).astype(jnp.bfloat16)
    b_enc_p = b_enc.reshape(1, FEATURE_COUNT).astype(jnp.float32)

    # Regressor fc_layers = [2048 + 85, 1024, 1024, 85].
    w1f = w1[:FEATURE_COUNT].astype(jnp.bfloat16)                          # (2048,1024)
    w1t = _pad_axis(w1[FEATURE_COUNT:], THETA_PAD, 0).astype(jnp.bfloat16)  # (85->128,1024)
    b1_p = b1.reshape(1, HIDDEN).astype(jnp.float32)
    w2_p = w2.astype(jnp.bfloat16)                                         # (1024,1024)
    b2_p = b2.reshape(1, HIDDEN).astype(jnp.float32)
    w3_p = _pad_axis(w3, THETA_PAD, 1).astype(jnp.bfloat16)                # (1024, 85->128)
    b3_p = _pad_axis(b3.reshape(1, THETA_COUNT), THETA_PAD, 1).astype(jnp.float32)

    return (w_enc_p, b_enc_p), (w1f, w1t, b1_p, w2_p, b2_p, w3_p, b3_p)


# ----------------------------------------------------------------------------
# HMRNetBase.forward (resnet50 path) + _calc_detail_info
# ----------------------------------------------------------------------------
def hmr_forward(x_nchw, enc_params, reg_params, mean_theta):
    n = x_nchw.shape[0]
    w_enc_p, b_enc_p = enc_params

    # NCHW -> (N, C*H*W); pad batch to a sublane multiple and d_in to TILE_K.
    x_flat = x_nchw.reshape(n, -1).astype(jnp.float32)
    x_p = _pad_axis(_pad_axis(x_flat, BATCH_TILE, 0), TILE_K, 1).astype(jnp.bfloat16)
    assert x_p.shape[1] == w_enc_p.shape[0]

    feature = encoder_forward(x_p, w_enc_p, b_enc_p)          # (N_pad, 2048) bf16

    # PyTorch: theta = self.mean_theta[:shape[0], :]
    mt = mean_theta[:n].astype(jnp.float32)
    mt_p = _pad_axis(_pad_axis(mt, BATCH_TILE, 0), THETA_PAD, 1)

    thetas_p = regressor_forward(feature, mt_p, reg_params)   # (N_pad, 128) f32
    thetas = thetas_p[:n, :THETA_COUNT]

    cam = thetas[:, 0:3]
    pose = thetas[:, 3:75]
    shape = thetas[:, 75:]
    return pose, shape, cam


# ----------------------------------------------------------------------------
# Deterministic synthetic parameters + demo run
# ----------------------------------------------------------------------------
if __name__ == "__main__":
    key = jax.random.PRNGKey(0)
    ks = jax.random.split(key, 8)

    N, C, H, W = 2, 3, 16, 16                     # small image input (NCHW)
    x = jax.random.normal(ks[0], (N, C, H, W), dtype=jnp.float32)

    d_in = C * H * W

    def scaled(k, shape, fan_in):
        return (jax.random.normal(k, shape, dtype=jnp.float32)
                / jnp.sqrt(jnp.float32(fan_in)))

    # Encoder proxy parameters.
    w_enc = scaled(ks[1], (d_in, FEATURE_COUNT), d_in)
    b_enc = jnp.zeros((1, FEATURE_COUNT), jnp.float32)

    # Regressor fc_layers = [2048+85, 1024, 1024, 85]
    in1 = FEATURE_COUNT + THETA_COUNT
    w1 = scaled(ks[2], (in1, HIDDEN), in1)
    b1 = 0.01 * jax.random.normal(ks[3], (1, HIDDEN), dtype=jnp.float32)
    w2 = scaled(ks[4], (HIDDEN, HIDDEN), HIDDEN)
    b2 = 0.01 * jax.random.normal(ks[5], (1, HIDDEN), dtype=jnp.float32)
    w3 = scaled(ks[6], (HIDDEN, THETA_COUNT), HIDDEN)
    b3 = jnp.zeros((1, THETA_COUNT), jnp.float32)

    # Synthetic SMPL mean theta (deterministic stand-in for util.load_mean_theta):
    # cam = [0.9, 0, 0], pose (72) and shape (10) zeros; tiled over batch.
    mean_vec = jnp.concatenate(
        [jnp.array([0.9, 0.0, 0.0], jnp.float32), jnp.zeros((82,), jnp.float32)]
    )
    mean_theta = jnp.tile(mean_vec, (N, 1))       # buffer 'mean_theta' (batch, 85)

    enc_params, reg_params = prepare_params(w_enc, b_enc, w1, b1, w2, b2, w3, b3)

    pose, shp, cam = hmr_forward(x, enc_params, reg_params, mean_theta)
    jax.block_until_ready((pose, shp, cam))

    assert pose.shape == (N, 72)
    assert shp.shape == (N, 10)
    assert cam.shape == (N, 3)
    print("KERNEL_OK")
</pallas_src>

<mosaic_0001>
module attributes {stable_mosaic.version = 11 : i64} {
  func.func @_encoder_kernel(%arg0: i32, %arg1: i32, %arg2: memref<8x256xbf16, #tpu.memory_space<vmem>>, %arg3: memref<256x256xbf16, #tpu.memory_space<vmem>>, %arg4: memref<1x256xf32, #tpu.memory_space<vmem>>, %arg5: memref<8x256xbf16, #tpu.memory_space<vmem>>, %arg6: memref<8x256xf32, #tpu.memory_space<vmem>>) attributes {dimension_semantics = [#tpu.dimension_semantics<parallel>, #tpu.dimension_semantics<arbitrary>], iteration_bounds = array<i64: 8, 3>, scalar_prefetch = 0 : i64, scratch_operands = 1 : i64, tpu.core_type = #tpu.core_type<tc>, window_params = [{transform_indices = @transform_0, window_bounds = array<i64: 8, 256>}, {transform_indices = @transform_1, window_bounds = array<i64: 256, 256>}, {transform_indices = @transform_2, window_bounds = array<i64: 1, 256>}, {transform_indices = @transform_3, window_bounds = array<i64: 8, 256>}]} {
    %c0_i32 = arith.constant 0 : i32
    %0 = arith.cmpi eq, %arg1, %c0_i32 : i32
    %1 = arith.extui %0 : i1 to i32
    %c0_i32_0 = arith.constant 0 : i32
    %2 = arith.cmpi ne, %1, %c0_i32_0 : i32
    scf.if %2 {
      %cst_9 = arith.constant 0.000000e+00 : f32
      %12 = vector.broadcast %cst_9 : f32 to vector<8x256xf32>
      %c0_10 = arith.constant 0 : index
      %c0_11 = arith.constant 0 : index
      %13 = vector.load %arg6[%c0_10, %c0_11] : memref<8x256xf32, #tpu.memory_space<vmem>>, vector<8x256xf32>
      tpu.vector_store %arg6[%c0_10, %c0_11], %12 {strides = array<i32>} : memref<8x256xf32, #tpu.memory_space<vmem>>, vector<8x256xf32>,
    } else {
    }
    %c0 = arith.constant 0 : index
    %c0_1 = arith.constant 0 : index
    %3 = vector.load %arg6[%c0, %c0_1] : memref<8x256xf32, #tpu.memory_space<vmem>>, vector<8x256xf32>
    %c0_2 = arith.constant 0 : index
    %c0_3 = arith.constant 0 : index
    %4 = vector.load %arg2[%c0_2, %c0_3] : memref<8x256xbf16, #tpu.memory_space<vmem>>, vector<8x256xbf16>
    %c0_4 = arith.constant 0 : index
    %c0_5 = arith.constant 0 : index
    %5 = vector.load %arg3[%c0_4, %c0_5] : memref<256x256xbf16, #tpu.memory_space<vmem>>, vector<256x256xbf16>
    %cst = arith.constant dense<0.000000e+00> : vector<8x256xf32>
    %6 = tpu.matmul %4, %5, %cst {dimension_numbers = #tpu.dot_dimension_numbers<[1], [0], [0], [1], [0, 0, 1, 1], [], []>} : vector<8x256xbf16>, vector<256x256xbf16>, vector<8x256xf32> -> vector<8x256xf32>
    %7 = arith.addf %3, %6 : vector<8x256xf32>
    %c0_6 = arith.constant 0 : index
    %c0_7 = arith.constant 0 : index
    %8 = vector.load %arg6[%c0_6, %c0_7] : memref<8x256xf32, #tpu.memory_space<vmem>>, vector<8x256xf32>
    tpu.vector_store %arg6[%c0_6, %c0_7], %7 {strides = array<i32>} : memref<8x256xf32, #tpu.memory_space<vmem>>, vector<8x256xf32>,
    %c2_i32 = arith.constant 2 : i32
    %9 = arith.cmpi eq, %arg1, %c2_i32 : i32
    %10 = arith.extui %9 : i1 to i32
    %c0_i32_8 = arith.constant 0 : i32
    %11 = arith.cmpi ne, %10, %c0_i32_8 : i32
    scf.if %11 {
      %c0_9 = arith.constant 0 : index
      %c0_10 = arith.constant 0 : index
      %12 = vector.load %arg6[%c0_9, %c0_10] : memref<8x256xf32, #tpu.memory_space<vmem>>, vector<8x256xf32>
      %c0_11 = arith.constant 0 : index
      %c0_12 = arith.constant 0 : index
      %13 = vector.load %arg4[%c0_11, %c0_12] : memref<1x256xf32, #tpu.memory_space<vmem>>, vector<1x256xf32>
      %14 = vector.broadcast %13 : vector<1x256xf32> to vector<8x256xf32>
      %15 = arith.addf %12, %14 : vector<8x256xf32>
      %cst_13 = arith.constant 0.000000e+00 : f32
      %16 = vector.broadcast %cst_13 : f32 to vector<8x256xf32>
      %17 = arith.maximumf %15, %16 : vector<8x256xf32>
      %18 = arith.truncf %17 : vector<8x256xf32> to vector<8x256xbf16>
      %c0_14 = arith.constant 0 : index
      %c0_15 = arith.constant 0 : index
      %19 = vector.load %arg5[%c0_14, %c0_15] : memref<8x256xbf16, #tpu.memory_space<vmem>>, vector<8x256xbf16>
      tpu.vector_store %arg5[%c0_14, %c0_15], %18 {strides = array<i32>} : memref<8x256xbf16, #tpu.memory_space<vmem>>, vector<8x256xbf16>,
    } else {
    }
    return
  }
  func.func @transform_0(%arg0: i32, %arg1: i32) -> (i32, i32) {
    %c0_i32 = arith.constant 0 : i32
    %c0_i32_0 = arith.constant 0 : i32
    return %c0_i32, %arg1 : i32, i32
  }
  func.func @transform_1(%arg0: i32, %arg1: i32) -> (i32, i32) {
    %c0_i32 = arith.constant 0 : i32
    return %arg1, %arg0 : i32, i32
  }
  func.func @transform_2(%arg0: i32, %arg1: i32) -> (i32, i32) {
    %c0_i32 = arith.constant 0 : i32
    %c0_i32_0 = arith.constant 0 : i32
    return %c0_i32, %arg0 : i32, i32
  }
  func.func @transform_3(%arg0: i32, %arg1: i32) -> (i32, i32) {
    %c0_i32 = arith.constant 0 : i32
    %c0_i32_0 = arith.constant 0 : i32
    return %c0_i32, %arg0 : i32, i32
  }
}

</mosaic_0001>

<bundles_post_ra>
// kernel: tpu_custom_call.1
= control target key start
LH: loop header
LB: loop body
LE: loop exit
PB: predicated region body
PF: predicated region fallthrough
CT: control target
= control target key end

     0   :  { %s1683_s0 = inlined_call_operand.hbm [shape: bf16[8,768], index: 0, kind: input, shape index: {}]   ;;  %s1684_s1 = inlined_call_operand.hbm [shape: bf16[768,2048], index: 1, kind: input, shape index: {}]   ;;  %s1685_s2 = inlined_call_operand.hbm [shape: f32[1,2048], index: 2, kind: input, shape index: {}]   ;;  %s1686_s3 = inlined_call_operand.hbm [shape: bf16[8,2048], index: 3, kind: output, shape index: {}]  }
   0x1   :  { %1699 = sst [smem:[#allocation20_spill]] %s1683_s0 }
   0x2   :  { %1700 = sst [smem:[#allocation21_spill]] %s1684_s1 }
   0x3   :  { %1701 = sst [smem:[#allocation22_spill]] %s1686_s3 }
   0x4   :  { %8 = vsyncpa [#allocation4], 0 }
   0x5   :  { %10 = vsyncpa [#allocation4 + $0x1], 0 }
   0x6   :  { %11 = vsyncpa [#allocation7], 0 }
   0x7   :  { %13 = vsyncpa [#allocation7 + $0x1], 0 }
   0x8   :  { %14 = vsyncpa [#allocation5], 0 }
   0x9   :  { %16 = vsyncpa [#allocation5 + $0x1], 0  ;;  %s1241_s12 = smov 0   ;;  %s1243_s13 = smov 0  }
   0xa   :  { %s1245_s14 = smov 0   ;;  %s1247_s15 = smov 0  }
   0xb   :  { %s1249_s16 = smov 0   ;;  %s1251_s17 = smov 0  }
   0xc   :  { %s1253_s18 = smov 0   ;;  %s1255_s19 = smov 0  }
   0xd   :  { %s1257_s20 = smov 0   ;;  %s1259_s21 = smov 0  }
   0xe   :  { %s1261_s22 = smov 0   ;;  %s1263_s23 = smov 0  }
   0xf   :  { %s1265_s24 = smov 0   ;;  %s1267_s25 = smov 0  }
  0x10 LB: > { %1702 = sst [smem:[#allocation14_spill]] %s1191_s20  ;;  %p1688_p0 = scmp.eq.s32.totalorder %s1211_s25, 0  ;;  %s1211_s25 = sphi %s1267_s25, %s22_s25   ;;  %s1207_s24 = sphi %s1265_s24, %s1743_s24   ;;  %s1203_s23 = sphi %s1263_s23, %s1753_s23   ;;  %s1199_s22 = sphi %s1261_s22, %s1741_s22   ;;  %s1195_s21 = sphi %s1259_s21, %s1752_s21   ;;  %s1191_s20 = sphi %s1257_s20, %s1740_s20   ;;  %s1187_s19 = sphi %s1255_s19, %s1751_s19   ;;  %s1183_s18 = sphi %s1253_s18, %s1750_s18   ;;  %s1179_s17 = sphi %s1251_s17, %s1749_s17   ;;  %s1175_s16 = sphi %s1249_s16, %s1748_s16   ;;  %s1171_s15 = sphi %s1247_s15, %s1747_s15   ;;  %s1167_s14 = sphi %s1245_s14, %s1746_s14   ;;  %s1163_s13 = sphi %s1243_s13, %s1745_s13   ;;  %s1159_s12 = sphi %s1241_s12, %s1744_s12  }
  0x11   : > { %1703 = sst [smem:[#allocation15_spill]] %s1199_s22  ;;  %p76_p1 = scmp.ne.s32.totalorder %s1179_s17, %s1175_s16 }
  0x12   : > { %1704 = sst [smem:[#allocation16_spill]] %s1207_s24  ;;  %p1687_p4 = scmp.lt.s32.totalorder %s1211_s25, 24 }
  0x13   : > { %p78_p3 = por %p76_p1, %p1688_p0  ;;  %s177_s28 = sand.u32 1, %s1211_s25  }
  0x14   : > { %s179_s29 = sand.u32 1, %s1179_s17   ;;  %s719_s4 = sshll.u32 %s1207_s24, 1 }
  0x15   : > { %s717_s30 = sshll.u32 %s179_s29, 8  ;;  %s773_s5 = sshll.u32 %s1203_s23, 9 }
  0x16   : > { %s181_s6 = scalar_lea.vmem [#allocation6], %s717_s30  ;;  %s188_s8 = sadd.s32 %s773_s5, %s719_s4 }
  0x17   : > { %s191_s7 = sshll.u32 %s181_s6, 4  ;;  %s721_s9 = sshll.u32 %s188_s8, 6  ;;  %s1325_s7 = int_to_ptr.vmem [resolvable:$true] %s191_s7 }
  0x18   : > { %p1329_p5 = pnand %p1687_p4, %p78_p3  ;;  %s1706_s1 = sld [smem:[#allocation21_spill]] }
  0x19   : > { %p725_p6 = scmp.ge.s32.totalorder %s1211_s25, 1  ;;  %s1339_s29 = scalar_lea.sflag [#allocation7], %s177_s28 }
  0x1a   : > { %p969_p8 = pneg %p1329_p5 }
  0x1e   : > { %s1336_s26 = scalar_lea.hbm %s1706_s1, %s721_s9  ;;  %s972_s5 = scalar_lea.hbm %s1706_s1, 98304 }
  0x1f   : > { %s967_s30 = scalar_lea.hbm %s1336_s26, 4096  ;;  %p973_p11 = scmp.lt.u32.totalorder %s1336_s26, %s1706_s1 }
  0x20   : > { %p968_p7 = scmp.ne.s32.totalorder %s1336_s26, %s967_s30  ;;  %p974_p12 = scmp.lt.u32.totalorder %s972_s5, %s967_s30 }
  0x21   : > { %p976_p1 = scmp.lt.u32.totalorder %s967_s30, %s1336_s26 }
  0x22   : > { %p970_p9 = pnand %p969_p8, %p968_p7  ;;  %p975_p13 = por %p974_p12, %p973_p11 }
  0x24   : > { %p971_p10 = pneg %p970_p9  ;;  %p977_p3 = por %p976_p1, %p975_p13 }
  0x26   : > { %p978_p4 = pnand %p977_p3, %p971_p10 }
  0x28   : > { %981 = shalt.err (!%p978_p4)
}
  0x29   : > { %s982_s28 = scalar_lea.vmem %s1325_s7, 4096  ;;  %s1213_s9 = smov [#allocation6]  }
  0x2a   : > { %p983_p7 = scmp.ne.s32.totalorder %s1325_s7, %s982_s28  ;;  %s987_s11 = sshll.u32 %s1213_s9, 4  ;;  %s988_s11 = int_to_ptr.vmem [resolvable:$false] %s987_s11 }
  0x2b   : > { %s989_s27 = scalar_lea.vmem %s988_s11, 8192  ;;  %p990_p0 = scmp.lt.s32.totalorder %s1325_s7, %s988_s11 }
  0x2c   : > { %p985_p9 = pnand %p983_p7, %p969_p8  ;;  %p991_p11 = scmp.lt.s32.totalorder %s989_s27, %s982_s28 }
  0x2e   : > { %p986_p2 = pneg %p985_p9  ;;  %p992_p12 = por %p991_p11, %p990_p0 }
  0x30   : > { %p993_p13 = pnand %p992_p12, %p986_p2 }
  0x32   : > { %996 = shalt.err (!%p993_p13)
}
  0x33   : > { %s1214_s30 = smov 1024   ;;  %s1215_s4 = smov 128  }
  0x34   : > { %s1216_s5 = smov 8   ;;  %p218_p0 = scmp.lt.s32.totalorder %s1211_s25, 25 }
  0x35   : > { %791 = dma.hbm_to_vmem [thread:$0]  (!%p1329_p5), %s1336_s26, 4096, %s1325_s7, %s1339_s29, %s1214_s30, %s1215_s4, %s1216_s5  }
  0x36   : > { %p1370_p2 = pnand %p725_p6, %p218_p0  ;;  %s1375_s8 = sadd.s32 4294967295, %s1211_s25  }
  0x37   : > { %s31_s28 = sadd.s32 1, %s1203_s23  ;;  %s41_s9 = sadd.s32 1, %s1191_s20 }
  0x38   : > { %s1707_s6 = scalar_select %p1370_p2, 1, 0 }
  0x39   : > { %p32_p4 = scmp.ge.s32.totalorder %s31_s28, 3  ;;  %p48_p5 = scmp.ne.s32.totalorder %s1191_s20, %s1187_s19 }
  0x3a   : > { %p54_p8 = scmp.ne.s32.totalorder %s1187_s19, %s1183_s18  ;;  %s1709_s26 = sadd.s32 1, %s1207_s24 }
  0x3b   : > { %s1755_s28 = smov (%p32_p4, %s31_s28), 0  ;;  %s1757_s26 = smov (!%p32_p4, %s1709_s26), %s1207_s24 }
  0x3c   : > { %1708 = sst [smem:[#allocation17_spill]] %s1755_s28  ;;  %s38_s7 = ssub.s32 %s1203_s23, %s1755_s28 }
  0x3d   : > { %p1710_p6 = scmp.eq.s32.totalorder %s1211_s25, 0  ;;  %p36_p1 = scmp.ge.s32.totalorder %s1757_s26, 8 }
  0x3e   : > { %p39_p3 = scmp.eq.s32.totalorder %s38_s7, 0  ;;  %p1692_p7 = scmp.eq.s32.totalorder %s1375_s8, 0 }
  0x3f   : > { %p1392_p10 = por %p1710_p6, %p48_p5  ;;  %s158_s18 = sand.u32 1, %s1191_s20  }
  0x40   : > { %s1759_s26 = smov (%p36_p1, %s1757_s26), 0  ;;  %p1405_p9 = por %p1692_p7, %p54_p8 }
  0x41   : > { %1712 = sst [smem:[#allocation18_spill]] %s1759_s26  ;;  %s1411_s30 = ssub.s32 %s1207_s24, %s1759_s26 }
  0x42   : > { %s1401_s11 = scalar_select %p39_p3, %s1191_s20, %s41_s9  }
  0x43   : > { %s1714_s27 = scalar_select %p1405_p9, 1, 0 }
  0x44   : > { %1713 = sst [smem:[#allocation19_spill]] %s1401_s11  ;;  %s66_s4 = sor.u32 %s1411_s30, %s38_s7 }
  0x45   : > { %p1715_p11 = scmp.ne.s32.totalorder %s1175_s16, %s1171_s15  ;;  %p67_p13 = scmp.eq.s32.totalorder %s66_s4, 0 }
  0x46   : > { %s714_s1 = sshll.u32 %s158_s18, 3  ;;  %s772_s28 = sshll.u32 %s1203_s23, 7 }
  0x47   : > { %p1419_p12 = por %p1715_p11, %p1692_p7  ;;  %s1717_s9 = sadd.s32 1, %s1179_s17 }
  0x48   : > { %s1427_s11 = scalar_select %p67_p13, %s1179_s17, %s1717_s9  }
  0x49   : > { %s1716_s5 = scalar_select %p1419_p12, 1, 0 }
  0x4a   : > { %s1718_s0 = sld [smem:[#allocation20_spill]]  ;;  %s162_s15 = scalar_lea.vmem [#allocation3], %s714_s1 }
  0x4b   : > { %s170_s7 = sshll.u32 %s162_s15, 4  ;;  %p1719_p0 = scmp.lt.s32.totalorder %s1211_s25, 24  ;;  %s1442_s7 = int_to_ptr.vmem [resolvable:$true] %s170_s7 }
  0x4c   : > { %s159_s9 = scalar_lea.sflag [#allocation4], %s158_s18 }
  0x4d   : > { %p1438_p4 = pnand %p1719_p0, %p1392_p10 }
  0x4f   : > { %p999_p8 = pneg %p1438_p4 }
  0x50   : > { %s1432_s22 = scalar_lea.hbm %s1718_s0, %s772_s28  ;;  %s1002_s28 = scalar_lea.hbm %s1718_s0, 384 }
  0x51   : > { %s997_s3 = scalar_lea.hbm %s1432_s22, 128  ;;  %p1003_p10 = scmp.lt.u32.totalorder %s1432_s22, %s1718_s0 }
  0x52   : > { %p998_p5 = scmp.ne.s32.totalorder %s1432_s22, %s997_s3  ;;  %p1004_p3 = scmp.lt.u32.totalorder %s1002_s28, %s997_s3 }
  0x53   : > { %p1006_p13 = scmp.lt.u32.totalorder %s997_s3, %s1432_s22 }
  0x54   : > { %p1000_p6 = pnand %p999_p8, %p998_p5  ;;  %p1005_p11 = por %p1004_p3, %p1003_p10 }
  0x56   : > { %p1001_p1 = pneg %p1000_p6  ;;  %p1007_p0 = por %p1006_p13, %p1005_p11 }
  0x58   : > { %p1008_p7 = pnand %p1007_p0, %p1001_p1 }
  0x5a   : > { %1011 = shalt.err (!%p1008_p7)
}
  0x5b   : > { %s1012_s18 = scalar_lea.vmem %s1442_s7, 128  ;;  %s1217_s1 = smov [#allocation3]  }
  0x5c   : > { %p1013_p5 = scmp.ne.s32.totalorder %s1442_s7, %s1012_s18  ;;  %s1017_s20 = sshll.u32 %s1217_s1, 4  ;;  %s1018_s20 = int_to_ptr.vmem [resolvable:$false] %s1017_s20 }
  0x5d   : > { %s1019_s10 = scalar_lea.vmem %s1018_s20, 256  ;;  %p1020_p9 = scmp.lt.s32.totalorder %s1442_s7, %s1018_s20 }
  0x5e   : > { %p1015_p6 = pnand %p1013_p5, %p999_p8  ;;  %p1021_p10 = scmp.lt.s32.totalorder %s1019_s10, %s1012_s18 }
  0x60   : > { %p1016_p12 = pneg %p1015_p6  ;;  %p1022_p3 = por %p1021_p10, %p1020_p9 }
  0x62   : > { %p1023_p11 = pnand %p1022_p3, %p1016_p12 }
  0x64   : > { %1026 = shalt.err (!%p1023_p11)
}
  0x65   : > { %788 = dma.hbm_to_vmem [thread:$0]  (!%p1438_p4), %s1432_s22, 128, %s1442_s7, %s159_s9  }
  0x66   : > { %s711_s3 = sadd.s32 4294967294, %s1211_s25   ;;  %p93_p7 = scmp.eq.s32.totalorder %s1411_s30, 0 }
  0x67   : > { %s95_s28 = sadd.s32 1, %s1167_s14  ;;  %p102_p9 = scmp.ne.s32.totalorder %s1167_s14, %s1163_s13 }
  0x68   : > { %s1475_s4 = scalar_select %p93_p7, %s1167_s14, %s95_s28  }
  0x69   : > { %p1721_p12 = scmp.eq.s32.totalorder %s1211_s25, 0  ;;  %p108_p1 = scmp.ne.s32.totalorder %s1163_s13, %s1159_s12 }
  0x6a   : > { %p132_p13 = scmp.eq.s32.totalorder %s1375_s8, 23  ;;  %p138_p0 = scmp.eq.s32.totalorder %s711_s3, 23 }
  0x6b   : > { %p1479_p8 = por %p102_p9, %p1721_p12  ;;  %p1723_p5 = scmp.eq.s32.totalorder %s1375_s8, 0 }
  0x6c   : > { %s203_s22 = sand.u32 1, %s1167_s14   ;;  %p1493_p4 = por %p132_p13, %p102_p9 }
  0x6d   : > { %p1488_p6 = por %p108_p1, %p1723_p5  ;;  %p1497_p10 = por %p138_p0, %p108_p1 }
  0x6e   : > { %s1725_s30 = scalar_select %p1493_p4, 1, 0 }
  0x6f   : > { %s1724_s18 = scalar_select %p1488_p6, 1, 0 }
  0x70   : > { %s1726_s7 = scalar_select %p1497_p10, 1, 0 }
  0x71   : > { %s722_s9 = sshll.u32 %s203_s22, 1  ;;  %s774_s1 = sshll.u32 %s1207_s24, 5 }
  0x72   : > { %s1505_s3 = scalar_lea.hbm %s1685_s2, %s774_s1  ;;  %s205_s28 = scalar_lea.vmem [#allocation8], %s722_s9 }
  0x73   : > { %s213_s0 = sshll.u32 %s205_s28, 4  ;;  %p1727_p3 = scmp.lt.s32.totalorder %s1211_s25, 24  ;;  %s214_s0 = int_to_ptr.vmem [resolvable:$true] %s213_s0 }
  0x74   : > { %s1027_s22 = scalar_lea.hbm %s1505_s3, 32  ;;  %s1032_s15 = scalar_lea.hbm %s1685_s2, 256 }
  0x75   : > { %p1511_p11 = pnand %p1727_p3, %p1479_p8  ;;  %p1028_p7 = scmp.ne.s32.totalorder %s1505_s3, %s1027_s22 }
  0x76   : > { %p1033_p8 = scmp.lt.u32.totalorder %s1505_s3, %s1685_s2  ;;  %p1034_p13 = scmp.lt.u32.totalorder %s1032_s15, %s1027_s22 }
  0x77   : > { %p1029_p9 = pneg %p1511_p11  ;;  %p1036_p5 = scmp.lt.u32.totalorder %s1027_s22, %s1505_s3 }
  0x78   : > { %p1035_p0 = por %p1034_p13, %p1033_p8 }
  0x79   : > { %p1030_p12 = pnand %p1029_p9, %p1028_p7 }
  0x7a   : > { %p1037_p3 = por %p1036_p5, %p1035_p0 }
  0x7b   : > { %p1031_p1 = pneg %p1030_p12 }
  0x7d   : > { %p1038_p10 = pnand %p1037_p3, %p1031_p1 }
  0x7f   : > { %1041 = shalt.err (!%p1038_p10)
}
  0x80   : > { %s1042_s28 = scalar_lea.vmem %s214_s0, 32  ;;  %s1218_s24 = smov [#allocation8]  }
  0x81   : > { %p1043_p4 = scmp.ne.s32.totalorder %s214_s0, %s1042_s28  ;;  %s1047_s1 = sshll.u32 %s1218_s24, 4  ;;  %s1048_s1 = int_to_ptr.vmem [resolvable:$false] %s1047_s1 }
  0x82   : > { %s1049_s9 = scalar_lea.vmem %s1048_s1, 64  ;;  %p1050_p6 = scmp.lt.s32.totalorder %s214_s0, %s1048_s1 }
  0x83   : > { %p1045_p7 = pnand %p1043_p4, %p1029_p9  ;;  %p1051_p2 = scmp.lt.s32.totalorder %s1049_s9, %s1042_s28 }
  0x85   : > { %p1046_p12 = pneg %p1045_p7  ;;  %p1052_p8 = por %p1051_p2, %p1050_p6 }
  0x87   : > { %p1053_p13 = pnand %p1052_p8, %p1046_p12 }
  0x89   : > { %1056 = shalt.err (!%p1053_p13)
}
  0x8a   : > { %794 = dma.hbm_to_vmem [thread:$0]  (!%p1511_p11), %s1505_s3, 32, %s214_s0, %s1339_s29  }
  0x8b   : > { %p1729_p10 = scmp.ne.s32.totalorder %s1707_s6, 0 }
  0x8c   : > { %s224_s22 = sand.u32 (!%p1729_p10), 1, %s1187_s19   ;;  %p1730_p4 = scmp.ne.s32.totalorder (!%p1729_p10), %s1714_s27, 0 }
  0x8d   : > { %222 = sbr.rel (%p1729_p10) target bundleno = 489 (0x1e9), region = 32  ;;  %s1540_s15 = sshll.u32 (!%p1729_p10), %s224_s22, 3 }
  0x8e   : > { %s225_s24 = scalar_lea.sflag (!%p1729_p10), [#allocation4], %s224_s22  ;;  %s228_s20 = scalar_lea.vmem (!%p1729_p10), [#allocation3], %s1540_s15 }
  0x94   : > { %1142 = dma.done.wait (%p1730_p4), %s225_s24, 128  }
  0x95   : > { %1144 = vsyncadd (%p1730_p4), %s225_s24, 4294967168  ;;  %s233_s0 = sand.u32 1, %s1375_s8   ;;  %s235_s29 = sand.u32 1, %s1175_s16  }
  0x96   : > { %s727_s6 = sshll.u32 %s235_s29, 8  ;;  %s234_s26 = scalar_lea.sflag [#allocation7], %s233_s0 }
  0x97   : > { %s1549_s3 = scalar_lea.vmem [#allocation6], %s727_s6  ;;  %p1731_p2 = scmp.ne.s32.totalorder %s1716_s5, 0 }
  0x99   : > { %1146 = dma.done.wait (%p1731_p2), %s234_s26, 4096  }
  0x9a   : > { %1148 = vsyncadd (%p1731_p2), %s234_s26, 4294963200  ;;  %s1556_s10 = sand.u32 1, %s1163_s13   ;;  %p1732_p6 = scmp.ne.s32.totalorder %s1724_s18, 0 }
  0x9b   : > { %s728_s27 = sshll.u32 %s1556_s10, 1 }
  0x9c   : > { %s1559_s28 = scalar_lea.vmem [#allocation8], %s728_s27 }
  0x9d   : > { %1150 = dma.done.wait (%p1732_p6), %s234_s26, 32  }
  0x9e   : > { %1152 = vsyncadd (%p1732_p6), %s234_s26, 4294967264  ;;  %s729_s8 = sshll.u32 %s1556_s10, 3  ;;  %p730_p11 = scmp.ne.s32.totalorder %s1195_s21, 0 }
  0x9f   : > { %s1566_s1 = scalar_lea.vmem [#allocation9], %s729_s8  ;;  %v1219_v0 = vmov (!%p730_p11), 0.0  }
  0xa0   : > { %287 = sbr.rel (%p730_p11) target bundleno = 167 (0xa7), region = 48  ;;  %288 = vst [vmem:[#allocation2] sm:$0xff] (!%p730_p11), %v1219_v0  ;;  %289 = vst [vmem:[#allocation2 + $0x8] sm:$0xff] (!%p730_p11), %v1219_v0 }
  0xa7 PF: > { %v917_v1 = vld [vmem:[%s1549_s3 + $0x4] ss:$8 sps:$4 sm:$0xff]   ;;  %v919_v2 = vld [vmem:[%s1549_s3] ss:$8 sps:$4 sm:$0xff]   ;;  %v920_v3 = vld [vmem:[%s1549_s3 + $0x14] ss:$8 sps:$4 sm:$0xff]  }
  0xa8   : > { %492 = vmatprep.subr.bf16.mxu0 %v917_v1  ;;  %v922_v4 = vld [vmem:[%s1549_s3 + $0x10] ss:$8 sps:$4 sm:$0xff]   ;;  %v923_v5 = vld [vmem:[%s1549_s3 + $0x24] ss:$8 sps:$4 sm:$0xff]   ;;  %v925_v6 = vld [vmem:[%s1549_s3 + $0x20] ss:$8 sps:$4 sm:$0xff]  }
  0xa9   : > { %493 = vmatpush1.bf16.msra.mxu0 %v919_v2  ;;  %v926_v7 = vld [vmem:[%s1549_s3 + $0x34] ss:$8 sps:$4 sm:$0xff]   ;;  %v928_v8 = vld [vmem:[%s1549_s3 + $0x30] ss:$8 sps:$4 sm:$0xff]   ;;  %v929_v9 = vld [vmem:[%s1549_s3 + $0x44] ss:$8 sps:$4 sm:$0xff]  }
  0xaa   : > { %494 = vmatprep.subr.bf16.mxu0 %v920_v3  ;;  %v931_v10 = vld [vmem:[%s1549_s3 + $0x40] ss:$8 sps:$4 sm:$0xff]   ;;  %v932_v11 = vld [vmem:[%s1549_s3 + $0x54] ss:$8 sps:$4 sm:$0xff]   ;;  %v934_v12 = vld [vmem:[%s1549_s3 + $0x50] ss:$8 sps:$4 sm:$0xff]  }
  0xab   : > { %v935_v13 = vld [vmem:[%s1549_s3 + $0x64] ss:$8 sps:$4 sm:$0xff]   ;;  %v292_v14 = vld [vmem:[%s228_s20] sm:$0xff]  ;;  %v937_v16 = vld [vmem:[%s1549_s3 + $0x60] ss:$8 sps:$4 sm:$0xff]   ;;  %p765_p9 = scmp.ne.s32.totalorder %s1195_s21, 2 }
  0xac   : > { %v732_v15 = vcombine.high %v292_v14, %v292_v14  ;;  %v938_v17 = vld [vmem:[%s1549_s3 + $0x74] ss:$8 sps:$4 sm:$0xff]   ;;  %v940_v18 = vld [vmem:[%s1549_s3 + $0x70] ss:$8 sps:$4 sm:$0xff]   ;;  %v941_v19 = vld [vmem:[%s1549_s3 + $0x84] ss:$8 sps:$4 sm:$0xff]   ;;  %v731_v35 = vcombine.low %v292_v14, %v292_v14  ;;  %v545_v44 = vlaneseq (!%p765_p9) }
  0xad   : > { %495 = vmatpush1.bf16.msra.mxu0 %v922_v4  ;;  %v943_v20 = vld [vmem:[%s1549_s3 + $0x80] ss:$8 sps:$4 sm:$0xff]   ;;  %v944_v21 = vld [vmem:[%s1549_s3 + $0x94] ss:$8 sps:$4 sm:$0xff]   ;;  %v946_v22 = vld [vmem:[%s1549_s3 + $0x90] ss:$8 sps:$4 sm:$0xff]  }
  0xae   : > { %496 = vmatprep.subr.bf16.mxu0 %v923_v5  ;;  %524 = vmatprep.mubr.bf16.mxu0 %v732_v15  ;;  %v947_v23 = vld [vmem:[%s1549_s3 + $0xa4] ss:$8 sps:$4 sm:$0xff]   ;;  %v949_v24 = vld [vmem:[%s1549_s3 + $0xa0] ss:$8 sps:$4 sm:$0xff]   ;;  %v950_v25 = vld [vmem:[%s1549_s3 + $0xb4] ss:$8 sps:$4 sm:$0xff]  }
  0xaf   : > { %v952_v26 = vld [vmem:[%s1549_s3 + $0xb0] ss:$8 sps:$4 sm:$0xff]   ;;  %v953_v27 = vld [vmem:[%s1549_s3 + $0xc4] ss:$8 sps:$4 sm:$0xff]   ;;  %v955_v28 = vld [vmem:[%s1549_s3 + $0xc0] ss:$8 sps:$4 sm:$0xff]  }
  0xb0   : > { %v956_v29 = vld [vmem:[%s1549_s3 + $0xd4] ss:$8 sps:$4 sm:$0xff]   ;;  %v958_v30 = vld [vmem:[%s1549_s3 + $0xd0] ss:$8 sps:$4 sm:$0xff]   ;;  %v959_v31 = vld [vmem:[%s1549_s3 + $0xe4] ss:$8 sps:$4 sm:$0xff]  }
  0xb1   : > { %497 = vmatpush1.bf16.msra.mxu0 %v925_v6  ;;  %v961_v32 = vld [vmem:[%s1549_s3 + $0xe0] ss:$8 sps:$4 sm:$0xff]   ;;  %v962_v33 = vld [vmem:[%s1549_s3 + $0xf4] ss:$8 sps:$4 sm:$0xff]   ;;  %v964_v34 = vld [vmem:[%s1549_s3 + $0xf0] ss:$8 sps:$4 sm:$0xff]  }
  0xb2   : > { %498 = vmatprep.subr.bf16.mxu0 %v926_v7  ;;  %v290_v36 = vld [vmem:[#allocation2] sm:$0xff]  ;;  %v291_v37 = vld [vmem:[#allocation2 + $0x8] sm:$0xff]  ;;  %v546_v45 = vshrl.u32 (!%p765_p9), %v545_v44, 7 }
  0xb3   : > { %v543_v46 = vld [vmem:[%s1559_s28] sm:$0x3] (!%p765_p9) }
  0xb4   : > { %v547_v47 = vsub.s32 (!%p765_p9), 0, %v546_v45  ;;  %v551_v48 = vsub.s32 (!%p765_p9), 1, %v546_v45 }
  0xb5   : > { %499 = vmatpush1.bf16.msra.mxu0 %v928_v8 }
  0xb6   : > { %500 = vmatprep.subr.bf16.mxu0 %v929_v9  ;;  %v548_v51 = vrot.slane (!%p765_p9), %v543_v46, %v547_v47  ;;  %v552_v52 = vrot.slane (!%p765_p9), %v543_v46, %v551_v48 }
  0xb9   : > { %501 = vmatpush1.bf16.msra.mxu0 %v931_v10 }
  0xba   : > { %502 = vmatprep.subr.bf16.mxu0 %v932_v11 }
  0xbd   : > { %503 = vmatpush1.bf16.msra.mxu0 %v934_v12 }
  0xbe   : > { %504 = vmatprep.subr.bf16.mxu0 %v935_v13 }
  0xc1   : > { %505 = vmatpush1.bf16.msra.mxu0 %v937_v16 }
  0xc2   : > { %506 = vmatprep.subr.bf16.mxu0 %v938_v17 }
  0xc5   : > { %507 = vmatpush1.bf16.msra.mxu0 %v940_v18 }
  0xc6   : > { %508 = vmatprep.subr.bf16.mxu0 %v941_v19 }
  0xc9   : > { %509 = vmatpush1.bf16.msra.mxu0 %v943_v20 }
  0xca   : > { %510 = vmatprep.subr.bf16.mxu0 %v944_v21 }
  0xcd   : > { %511 = vmatpush1.bf16.msra.mxu0 %v946_v22 }
  0xce   : > { %512 = vmatprep.subr.bf16.mxu0 %v947_v23 }
  0xd1   : > { %513 = vmatpush1.bf16.msra.mxu0 %v949_v24 }
  0xd2   : > { %514 = vmatprep.subr.bf16.mxu0 %v950_v25 }
  0xd5   : > { %515 = vmatpush1.bf16.msra.mxu0 %v952_v26 }
  0xd6   : > { %516 = vmatprep.subr.bf16.mxu0 %v953_v27 }
  0xd9   : > { %517 = vmatpush1.bf16.msra.mxu0 %v955_v28 }
  0xda   : > { %518 = vmatprep.subr.bf16.mxu0 %v956_v29 }
  0xdd   : > { %519 = vmatpush1.bf16.msra.mxu0 %v958_v30 }
  0xde   : > { %520 = vmatprep.subr.bf16.mxu0 %v959_v31 }
  0xe1   : > { %521 = vmatpush1.bf16.msra.mxu0 %v961_v32 }
  0xe2   : > { %522 = vmatprep.subr.bf16.mxu0 %v962_v33 }
  0xe5   : > { %523 = vmatpush1.bf16.msra.mxu0 %v964_v34 }
  0xe8   : > { %525 = vmatmul.mubr.bf16.vlgmr.msra.gmra.mrb[0].mxu0 %v731_v35 }
 0x1b9   : > { %540 = sbr.rel (%p765_p9) target bundleno = 462 (0x1ce), region = 52 }
 0x1bb   : > { %v526_v38 = vpop.f32.mrb[0].mxu0 }
 0x1bc   : > { %v533_v39 = vadd.f32 %v526_v38, %v290_v36  ;;  %v528_v40 = vpop.f32.mrb[1].mxu0 }
 0x1bd   : > { %v534_v41 = vadd.f32 %v528_v40, %v291_v37  ;;  %v530_v42 = vpop.f32.mrb[2].mxu0 }
 0x1be   : > { %535 = vst [vmem:[#allocation2] sm:$0xff] %v533_v39  ;;  %v531_v43 = vpop.f32.mrb[3].mxu0 }
 0x1bf   : > { %536 = vst [vmem:[#allocation2 + $0x8] sm:$0xff] %v534_v41 }
 0x1c5   : > { %v541_v49 = vld [vmem:[#allocation2] sm:$0xff] }
 0x1c6   : > { %v542_v50 = vld [vmem:[#allocation2 + $0x8] sm:$0xff]  ;;  %v555_v53 = vadd.f32 %v548_v51, %v541_v49 }
 0x1c7   : > { %v556_v54 = vadd.f32 %v552_v52, %v542_v50 }
 0x1c8   : > { %v557_v55 = vmax.f32 %v555_v53, 0.0 }
 0x1c9   : > { %v558_v56 = vmax.f32 %v556_v54, 0.0 }
 0x1cb   : > { %v775_v57 = vpack.c.bf16 %v558_v56, %v557_v55 }
 0x1cd   : > { %567 = vst [vmem:[%s1566_s1] sm:$0xff] %v775_v57 }
 0x1ce PF: > { %s1733_s21 = sld [smem:[#allocation15_spill]]  ;;  %s1734_s22 = sld [smem:[#allocation22_spill]] }
 0x1cf   : > { %s583_s24 = sshll.u32 %s1566_s1, 4  ;;  %s569_s20 = scalar_lea.sflag [#allocation5], %s1556_s10  ;;  %s584_s24 = int_to_ptr.vmem [resolvable:$true] %s583_s24 }
 0x1d0   : > { %s1057_s29 = scalar_lea.vmem %s584_s24, 128  ;;  %p1736_p0 = scmp.ne.s32.totalorder %s1725_s30, 0 }
 0x1d1   : > { %p1058_p1 = scmp.ne.s32.totalorder %s584_s24, %s1057_s29  ;;  %s1220_s6 = smov [#allocation9]  }
 0x1d2   : > { %s1061_s26 = sshll.u32 %s1220_s6, 4  ;;  %s1062_s26 = int_to_ptr.vmem [resolvable:$false] %s1061_s26 }
 0x1d3   : > { %p1059_p5 = pnand %p1058_p1, %p1736_p0  ;;  %s1063_s3 = scalar_lea.vmem %s1062_s26, 256 }
 0x1d4   : > { %s776_s5 = sshll.u32 %s1733_s21, 7  ;;  %s1735_s0 = smov %s1734_s22 }
 0x1d5   : > { %s1610_s15 = scalar_lea.hbm %s1734_s22, %s776_s5  ;;  %p1060_p3 = pneg %p1059_p5 }
 0x1d6   : > { %p1064_p7 = scmp.lt.s32.totalorder %s584_s24, %s1062_s26  ;;  %p1065_p12 = scmp.lt.s32.totalorder %s1063_s3, %s1057_s29 }
 0x1d8   : > { %p1066_p8 = por %p1065_p12, %p1064_p7 }
 0x1da   : > { %p1067_p13 = pnand %p1066_p8, %p1060_p3 }
 0x1dc   : > { %1070 = shalt.err (!%p1067_p13)
}
 0x1dd   : > { %s1071_s10 = scalar_lea.hbm %s1610_s15, 128  ;;  %s1075_s8 = scalar_lea.hbm %s1735_s0, 1024 }
 0x1de   : > { %p1072_p10 = scmp.ne.s32.totalorder %s1610_s15, %s1071_s10  ;;  %p1076_p6 = scmp.lt.u32.totalorder %s1610_s15, %s1735_s0 }
 0x1df   : > { %p1077_p11 = scmp.lt.u32.totalorder %s1075_s8, %s1071_s10  ;;  %p1079_p1 = scmp.lt.u32.totalorder %s1071_s10, %s1610_s15 }
 0x1e0   : > { %p1073_p4 = pnand %p1072_p10, %p1736_p0 }
 0x1e1   : > { %p1078_p9 = por %p1077_p11, %p1076_p6 }
 0x1e2   : > { %p1074_p2 = pneg %p1073_p4 }
 0x1e3   : > { %p1080_p5 = por %p1079_p1, %p1078_p9 }
 0x1e5   : > { %p1081_p3 = pnand %p1080_p5, %p1074_p2 }
 0x1e7   : > { %1084 = shalt.err (!%p1081_p3)
}
 0x1e8   : > { %783 = dma.vmem_to_hbm [thread:$0]  (%p1736_p0), %s584_s24, 128, %s1610_s15, %s569_s20  }
 0x1e9 PF: > { %p800_p7 = scmp.ge.s32.totalorder %s1211_s25, 2  ;;  %s595_s5 = sand.u32 1, %s1159_s12  }
 0x1ea   : > { %p1737_p12 = scmp.ne.s32.totalorder %s1726_s7, 0  ;;  %s596_s18 = scalar_lea.sflag [#allocation5], %s595_s5 }
 0x1ec   : > { %p796_p8 = pnand %p800_p7, %p1737_p12 }
 0x1ee   : > { %1154 = dma.done.wait (!%p796_p8), %s596_s18, 128  }
 0x1ef   : > { %1156 = vsyncadd (!%p796_p8), %s596_s18, 4294967168  ;;  %s22_s25 = sadd.s32 1, %s1211_s25   ;;  %s1739_s30 = sld [smem:[#allocation14_spill]] }
 0x1f0   : > { %p1636_p13 = scmp.ge.s32.totalorder %s22_s25, 26   ;;  %s1740_s20 = sld [smem:[#allocation19_spill]] }
 0x1f1   : > { %s1741_s22 = sld [smem:[#allocation16_spill]]  ;;  %s1742_s7 = sld [smem:[#allocation17_spill]] }
 0x1f2   : > { %s1743_s24 = sld [smem:[#allocation18_spill]]  ;;  %s1744_s12 = smov %s1163_s13 }
 0x1f3   : > { %s1745_s13 = smov %s1167_s14  ;;  %s1746_s14 = smov %s1475_s4 }
 0x1f4   : > { %s1747_s15 = smov %s1175_s16  ;;  %s1748_s16 = smov %s1179_s17 }
 0x1f5   : > { %s1749_s17 = smov %s1427_s11  ;;  %s1750_s18 = smov %s1187_s19 }
 0x1f6   : > { %s1751_s19 = smov %s1739_s30  ;;  %s1752_s21 = smov %s1203_s23 }
 0x1f7   : > { %s1753_s23 = smov %s1742_s7  ;;  %21 = sbr.rel (!%p1636_p13) target bundleno = 16 (0x10), region = 109 }
 0x1fe   :  { %601 = vsyncpa [#allocation4], 1 }
 0x1ff   :  { %603 = vsyncpa [#allocation4 + $0x1], 1 }
 0x200   :  { %604 = vsyncpa [#allocation7], 1 }
 0x201   :  { %606 = vsyncpa [#allocation7 + $0x1], 1 }
 0x202   :  { %607 = vsyncpa [#allocation5], 1 }
 0x203   :  { %609 = vsyncpa [#allocation5 + $0x1], 1 }

</bundles_post_ra>
